<compile_context>
chip_gen: v7x
topology: tpu7x:2x2x1
jax: 0.10.0
libtpu: 0.0.40
codegen_flags: <defaults>
</compile_context>

<pallas_src>
import functools

import jax
import jax.numpy as jnp
from jax.experimental import pallas as pl
from jax.experimental.pallas import tpu as pltpu

EPS = 1e-5
_VMEM_LIMIT = 32 * 1024 * 1024  # explicit scoped-VMEM budget, safe on v5e/v6e/v7x


def _choose_tiles(N, C, HW, itemsize, block_bytes=2 * 1024 * 1024):
    """Pick (TC, TL): channel tile (sublane dim) and flattened-spatial tile (lane dim)."""
    # Channel tile: sublane-aligned multiple of 8 when it divides C, else full C
    # (full-extent blocks are always legal).
    TC = 8 if C % 8 == 0 else C
    # Spatial tile: largest multiple of 128 that divides HW while one x block
    # (N * TC * TL * itemsize) stays within the per-block byte budget.
    max_elems = max(128, block_bytes // (itemsize * N * TC))
    TL = None
    d = 128
    limit = min(HW, max_elems)
    while d <= limit:
        if HW % d == 0:
            TL = d
        d += 128
    if TL is None:
        TL = HW  # full extent (covers HW < 128 or HW with no 128-multiple divisor)
    return TC, TL


def _stats_kernel(xr_ref, xi_ref, wrr_ref, wri_ref, wii_ref, br_ref, bi_ref,
                  zrr_ref, zri_ref, zir_ref, zii_ref, cr_ref, ci_ref,
                  sr_acc, si_acc, srr_acc, sri_acc, sii_acc,
                  *, inv_count):
    """Accumulate raw complex moments over the L grid axis; finalize per-channel
    whitening+affine coefficients and effective biases at the last step."""
    li = pl.program_id(1)

    @pl.when(li == 0)
    def _init():
        sr_acc[...] = jnp.zeros_like(sr_acc)
        si_acc[...] = jnp.zeros_like(si_acc)
        srr_acc[...] = jnp.zeros_like(srr_acc)
        sri_acc[...] = jnp.zeros_like(sri_acc)
        sii_acc[...] = jnp.zeros_like(sii_acc)

    xr = xr_ref[...].astype(jnp.float32)   # [N, TC, TL]
    xi = xi_ref[...].astype(jnp.float32)

    def rsum(v):                           # [N, TC, TL] -> [TC, 1]
        return jnp.sum(jnp.sum(v, axis=2, keepdims=True), axis=0)

    # One sweep over the resident tile: all five raw moments.
    sr_acc[...] += rsum(xr)
    si_acc[...] += rsum(xi)
    srr_acc[...] += rsum(xr * xr)
    sri_acc[...] += rsum(xr * xi)
    sii_acc[...] += rsum(xi * xi)

    @pl.when(li == pl.num_programs(1) - 1)
    def _finalize():
        # Means / covariance from raw moments (f32 accumulation; inputs are
        # activation-scale so cancellation is benign).
        Mr = sr_acc[...] * inv_count                       # [TC, 1]
        Mi = si_acc[...] * inv_count
        Vrr = srr_acc[...] * inv_count - Mr * Mr + EPS
        Vri = sri_acc[...] * inv_count - Mr * Mi
        Vii = sii_acc[...] * inv_count - Mi * Mi + EPS

        # Inverse matrix square root of the 2x2 covariance.
        tau = Vrr + Vii
        delta = Vrr * Vii - Vri * Vri
        s = jnp.sqrt(delta)
        t = jnp.sqrt(tau + 2.0 * s)
        # O(C) work only -> keep the exact reciprocal for numerical fidelity.
        rst = 1.0 / (s * t)
        Urr = (s + Vii) * rst
        Uii = (s + Vrr) * rst
        Uri = -Vri * rst

        # Affine 2x2 mix, folded with the mean into effective biases so the
        # apply pass is a pure per-element FMA (no centered temporaries).
        Wrr = wrr_ref[...]
        Wri = wri_ref[...]
        Wii = wii_ref[...]
        Zrr = Wrr * Urr + Wri * Uri
        Zri = Wrr * Uri + Wri * Uii
        Zir = Wri * Urr + Wii * Uri
        Zii = Wri * Uri + Wii * Uii

        zrr_ref[...] = Zrr
        zri_ref[...] = Zri
        zir_ref[...] = Zir
        zii_ref[...] = Zii
        cr_ref[...] = br_ref[...] - Zrr * Mr - Zri * Mi
        ci_ref[...] = bi_ref[...] - Zir * Mr - Zii * Mi


def _apply_kernel(xr_ref, xi_ref, zrr_ref, zri_ref, zir_ref, zii_ref,
                  cr_ref, ci_ref, yr_ref, yi_ref):
    """yr = Zrr*xr + Zri*xi + Cr ; yi = Zir*xr + Zii*xi + Ci (per channel)."""
    xr = xr_ref[...].astype(jnp.float32)   # [N, TC, TL]
    xi = xi_ref[...].astype(jnp.float32)

    def bcast(ref):                        # [TC, 1] -> [1, TC, 1]
        v = ref[...]
        return v.reshape((1,) + v.shape)

    zrr = bcast(zrr_ref)
    zri = bcast(zri_ref)
    zir = bcast(zir_ref)
    zii = bcast(zii_ref)
    cr = bcast(cr_ref)
    ci = bcast(ci_ref)

    yr_ref[...] = (zrr * xr + zri * xi + cr).astype(yr_ref.dtype)
    yi_ref[...] = (zir * xr + zii * xi + ci).astype(yi_ref.dtype)


def complex_batch_norm(xr, xi, wrr, wri, wii, br, bi,
                       block_bytes=2 * 1024 * 1024):
    """xr, xi: [N, C, H, W]; params: [C]. Returns (yr, yi) in NCHW."""
    N, C, H, W = xr.shape
    HW = H * W

    # Free, contiguous view: NCHW -> [N, C, H*W]. No transposes on either side.
    xr3 = xr.reshape(N, C, HW)
    xi3 = xi.reshape(N, C, HW)

    TC, TL = _choose_tiles(N, C, HW, jnp.dtype(xr.dtype).itemsize, block_bytes)
    grid = (C // TC, HW // TL)

    p = lambda v: v.reshape(C, 1).astype(jnp.float32)

    x_spec = pl.BlockSpec((N, TC, TL), lambda ci, li: (0, ci, li))
    c_spec = pl.BlockSpec((TC, 1), lambda ci, li: (ci, 0))
    coef_shape = jax.ShapeDtypeStruct((C, 1), jnp.float32)

    # ---- Pass 1: per-channel statistics -> whitening/affine coefficients ----
    stats_call = pl.pallas_call(
        functools.partial(_stats_kernel, inv_count=1.0 / float(N * HW)),
        out_shape=(coef_shape,) * 6,
        grid_spec=pltpu.PrefetchScalarGridSpec(
            num_scalar_prefetch=0,
            grid=grid,
            in_specs=[x_spec, x_spec] + [c_spec] * 5,
            out_specs=(c_spec,) * 6,
            scratch_shapes=[pltpu.VMEM((TC, 1), jnp.float32)] * 5,
        ),
        compiler_params=pltpu.CompilerParams(
            dimension_semantics=("parallel", "arbitrary"),
            vmem_limit_bytes=_VMEM_LIMIT,
        ),
    )
    zrr, zri, zir, zii, cr, ci = stats_call(
        xr3, xi3, p(wrr), p(wri), p(wii), p(br), p(bi))

    # ---- Pass 2: streaming elementwise normalization ----
    apply_call = pl.pallas_call(
        _apply_kernel,
        out_shape=(jax.ShapeDtypeStruct((N, C, HW), xr.dtype),
                   jax.ShapeDtypeStruct((N, C, HW), xi.dtype)),
        grid_spec=pltpu.PrefetchScalarGridSpec(
            num_scalar_prefetch=0,
            grid=grid,
            in_specs=[x_spec, x_spec] + [c_spec] * 6,
            out_specs=(x_spec, x_spec),
        ),
        compiler_params=pltpu.CompilerParams(
            dimension_semantics=("parallel", "parallel"),
            vmem_limit_bytes=_VMEM_LIMIT,
        ),
    )
    yr3, yi3 = apply_call(xr3, xi3, zrr, zri, zir, zii, cr, ci)

    return yr3.reshape(N, C, H, W), yi3.reshape(N, C, H, W)


def _reference(xr, xi, wrr, wri, wii, br, bi):
    """Pure-JAX port of the PyTorch forward (training mode) for validation."""
    vdim = (1, -1, 1, 1)
    Mr = jnp.mean(xr, axis=(0, 2, 3), keepdims=True)
    Mi = jnp.mean(xi, axis=(0, 2, 3), keepdims=True)
    xr, xi = xr - Mr, xi - Mi
    Vrr = jnp.mean(xr * xr, axis=(0, 2, 3), keepdims=True) + EPS
    Vri = jnp.mean(xr * xi, axis=(0, 2, 3), keepdims=True)
    Vii = jnp.mean(xi * xi, axis=(0, 2, 3), keepdims=True) + EPS
    tau = Vrr + Vii
    delta = Vrr * Vii - Vri * Vri
    s = jnp.sqrt(delta)
    t = jnp.sqrt(tau + 2 * s)
    rst = 1.0 / (s * t)
    Urr, Uii, Uri = (s + Vii) * rst, (s + Vrr) * rst, -Vri * rst
    Wrr, Wri, Wii = (w.reshape(vdim) for w in (wrr, wri, wii))
    Zrr = Wrr * Urr + Wri * Uri
    Zri = Wrr * Uri + Wri * Uii
    Zir = Wri * Urr + Wii * Uri
    Zii = Wri * Uri + Wii * Uii
    yr = Zrr * xr + Zri * xi + br.reshape(vdim)
    yi = Zir * xr + Zii * xi + bi.reshape(vdim)
    return yr, yi


def _run_case(key, N, C, H, W, block_bytes=2 * 1024 * 1024):
    k_xr, k_xi, k_wri = jax.random.split(key, 3)
    xr = jax.random.normal(k_xr, (N, C, H, W), dtype=jnp.float32)
    xi = jax.random.normal(k_xi, (N, C, H, W), dtype=jnp.float32)

    # Parameter init mirroring reset_parameters():
    #   Wrr = Wii = 1, Br = Bi = 0, Wri ~ U(-0.9, 0.9) (deterministic seed).
    wrr = jnp.ones((C,), jnp.float32)
    wii = jnp.ones((C,), jnp.float32)
    wri = jax.random.uniform(k_wri, (C,), jnp.float32, minval=-0.9, maxval=0.9)
    br = jnp.zeros((C,), jnp.float32)
    bi = jnp.zeros((C,), jnp.float32)

    yr, yi = complex_batch_norm(xr, xi, wrr, wri, wii, br, bi,
                                block_bytes=block_bytes)
    yr = jax.block_until_ready(yr)
    yi = jax.block_until_ready(yi)

    yr_ref, yi_ref = _reference(xr, xi, wrr, wri, wii, br, bi)
    assert yr.shape == (N, C, H, W) and yi.shape == (N, C, H, W)
    assert jnp.allclose(yr, yr_ref, atol=1e-4, rtol=1e-4), \
        float(jnp.max(jnp.abs(yr - yr_ref)))
    assert jnp.allclose(yi, yi_ref, atol=1e-4, rtol=1e-4), \
        float(jnp.max(jnp.abs(yi - yi_ref)))


if __name__ == "__main__":
    key = jax.random.PRNGKey(0)
    k0, k1 = jax.random.split(key)

    # Primary small case consistent with the module (single-block grid).
    _run_case(k0, N=2, C=4, H=16, W=16)

    # Second case exercising the tiled path: multiple channel blocks (TC=8,
    # "parallel" axis) and multiple L blocks (forced via a small block budget)
    # so the streaming raw-moment accumulation is actually used.
    _run_case(k1, N=2, C=16, H=32, W=32, block_bytes=16 * 1024)

    print("KERNEL_OK")
</pallas_src>

<mosaic_0001>
module attributes {stable_mosaic.version = 11 : i64} {
  func.func @_stats_kernel(%arg0: i32, %arg1: i32, %arg2: memref<2x4x256xf32, #tpu.memory_space<vmem>>, %arg3: memref<2x4x256xf32, #tpu.memory_space<vmem>>, %arg4: memref<4x1xf32, #tpu.memory_space<vmem>>, %arg5: memref<4x1xf32, #tpu.memory_space<vmem>>, %arg6: memref<4x1xf32, #tpu.memory_space<vmem>>, %arg7: memref<4x1xf32, #tpu.memory_space<vmem>>, %arg8: memref<4x1xf32, #tpu.memory_space<vmem>>, %arg9: memref<4x1xf32, #tpu.memory_space<vmem>>, %arg10: memref<4x1xf32, #tpu.memory_space<vmem>>, %arg11: memref<4x1xf32, #tpu.memory_space<vmem>>, %arg12: memref<4x1xf32, #tpu.memory_space<vmem>>, %arg13: memref<4x1xf32, #tpu.memory_space<vmem>>, %arg14: memref<4x1xf32, #tpu.memory_space<vmem>>, %arg15: memref<4x1xf32, #tpu.memory_space<vmem>>, %arg16: memref<4x1xf32, #tpu.memory_space<vmem>>, %arg17: memref<4x1xf32, #tpu.memory_space<vmem>>, %arg18: memref<4x1xf32, #tpu.memory_space<vmem>>, %arg19: memref<4x1xf32, #tpu.memory_space<vmem>>) attributes {dimension_semantics = [#tpu.dimension_semantics<parallel>, #tpu.dimension_semantics<arbitrary>], iteration_bounds = array<i64: 1, 1>, scalar_prefetch = 0 : i64, scratch_operands = 5 : i64, tpu.core_type = #tpu.core_type<tc>, window_params = [{transform_indices = @transform_0, window_bounds = array<i64: 2, 4, 256>}, {transform_indices = @transform_1, window_bounds = array<i64: 2, 4, 256>}, {transform_indices = @transform_2, window_bounds = array<i64: 4, 1>}, {transform_indices = @transform_3, window_bounds = array<i64: 4, 1>}, {transform_indices = @transform_4, window_bounds = array<i64: 4, 1>}, {transform_indices = @transform_5, window_bounds = array<i64: 4, 1>}, {transform_indices = @transform_6, window_bounds = array<i64: 4, 1>}, {transform_indices = @transform_7, window_bounds = array<i64: 4, 1>}, {transform_indices = @transform_8, window_bounds = array<i64: 4, 1>}, {transform_indices = @transform_9, window_bounds = array<i64: 4, 1>}, {transform_indices = @transform_10, window_bounds = array<i64: 4, 1>}, {transform_indices = @transform_11, window_bounds = array<i64: 4, 1>}, {transform_indices = @transform_12, window_bounds = array<i64: 4, 1>}]} {
    %c0_i32 = arith.constant 0 : i32
    %0 = arith.cmpi eq, %arg1, %c0_i32 : i32
    %1 = arith.extui %0 : i1 to i32
    %c0_i32_0 = arith.constant 0 : i32
    %2 = arith.cmpi ne, %1, %c0_i32_0 : i32
    scf.if %2 {
      %cst_37 = arith.constant 0.000000e+00 : f32
      %41 = vector.broadcast %cst_37 : f32 to vector<4x1xf32>
      %c0_38 = arith.constant 0 : index
      %c0_39 = arith.constant 0 : index
      %42 = vector.load %arg15[%c0_38, %c0_39] : memref<4x1xf32, #tpu.memory_space<vmem>>, vector<4x1xf32>
      tpu.vector_store %arg15[%c0_38, %c0_39], %41 {strides = array<i32>} : memref<4x1xf32, #tpu.memory_space<vmem>>, vector<4x1xf32>,
      %cst_40 = arith.constant 0.000000e+00 : f32
      %43 = vector.broadcast %cst_40 : f32 to vector<4x1xf32>
      %c0_41 = arith.constant 0 : index
      %c0_42 = arith.constant 0 : index
      %44 = vector.load %arg16[%c0_41, %c0_42] : memref<4x1xf32, #tpu.memory_space<vmem>>, vector<4x1xf32>
      tpu.vector_store %arg16[%c0_41, %c0_42], %43 {strides = array<i32>} : memref<4x1xf32, #tpu.memory_space<vmem>>, vector<4x1xf32>,
      %cst_43 = arith.constant 0.000000e+00 : f32
      %45 = vector.broadcast %cst_43 : f32 to vector<4x1xf32>
      %c0_44 = arith.constant 0 : index
      %c0_45 = arith.constant 0 : index
      %46 = vector.load %arg17[%c0_44, %c0_45] : memref<4x1xf32, #tpu.memory_space<vmem>>, vector<4x1xf32>
      tpu.vector_store %arg17[%c0_44, %c0_45], %45 {strides = array<i32>} : memref<4x1xf32, #tpu.memory_space<vmem>>, vector<4x1xf32>,
      %cst_46 = arith.constant 0.000000e+00 : f32
      %47 = vector.broadcast %cst_46 : f32 to vector<4x1xf32>
      %c0_47 = arith.constant 0 : index
      %c0_48 = arith.constant 0 : index
      %48 = vector.load %arg18[%c0_47, %c0_48] : memref<4x1xf32, #tpu.memory_space<vmem>>, vector<4x1xf32>
      tpu.vector_store %arg18[%c0_47, %c0_48], %47 {strides = array<i32>} : memref<4x1xf32, #tpu.memory_space<vmem>>, vector<4x1xf32>,
      %cst_49 = arith.constant 0.000000e+00 : f32
      %49 = vector.broadcast %cst_49 : f32 to vector<4x1xf32>
      %c0_50 = arith.constant 0 : index
      %c0_51 = arith.constant 0 : index
      %50 = vector.load %arg19[%c0_50, %c0_51] : memref<4x1xf32, #tpu.memory_space<vmem>>, vector<4x1xf32>
      tpu.vector_store %arg19[%c0_50, %c0_51], %49 {strides = array<i32>} : memref<4x1xf32, #tpu.memory_space<vmem>>, vector<4x1xf32>,
    } else {
    }
    %c0 = arith.constant 0 : index
    %c0_1 = arith.constant 0 : index
    %c0_2 = arith.constant 0 : index
    %3 = vector.load %arg2[%c0, %c0_1, %c0_2] : memref<2x4x256xf32, #tpu.memory_space<vmem>>, vector<2x4x256xf32>
    %c0_3 = arith.constant 0 : index
    %c0_4 = arith.constant 0 : index
    %c0_5 = arith.constant 0 : index
    %4 = vector.load %arg3[%c0_3, %c0_4, %c0_5] : memref<2x4x256xf32, #tpu.memory_space<vmem>>, vector<2x4x256xf32>
    %c0_6 = arith.constant 0 : index
    %c0_7 = arith.constant 0 : index
    %5 = vector.load %arg15[%c0_6, %c0_7] : memref<4x1xf32, #tpu.memory_space<vmem>>, vector<4x1xf32>
    %cst = arith.constant dense<0.000000e+00> : vector<2x4xf32>
    %6 = vector.multi_reduction <add>, %3, %cst [2] : vector<2x4x256xf32> to vector<2x4xf32>
    %7 = vector.shape_cast %6 : vector<2x4xf32> to vector<2x4x1xf32>
    %cst_8 = arith.constant dense<0.000000e+00> : vector<4x1xf32>
    %8 = vector.multi_reduction <add>, %7, %cst_8 [0] : vector<2x4x1xf32> to vector<4x1xf32>
    %9 = arith.addf %5, %8 : vector<4x1xf32>
    %c0_9 = arith.constant 0 : index
    %c0_10 = arith.constant 0 : index
    %10 = vector.load %arg15[%c0_9, %c0_10] : memref<4x1xf32, #tpu.memory_space<vmem>>, vector<4x1xf32>
    tpu.vector_store %arg15[%c0_9, %c0_10], %9 {strides = array<i32>} : memref<4x1xf32, #tpu.memory_space<vmem>>, vector<4x1xf32>,
    %c0_11 = arith.constant 0 : index
    %c0_12 = arith.constant 0 : index
    %11 = vector.load %arg16[%c0_11, %c0_12] : memref<4x1xf32, #tpu.memory_space<vmem>>, vector<4x1xf32>
    %cst_13 = arith.constant dense<0.000000e+00> : vector<2x4xf32>
    %12 = vector.multi_reduction <add>, %4, %cst_13 [2] : vector<2x4x256xf32> to vector<2x4xf32>
    %13 = vector.shape_cast %12 : vector<2x4xf32> to vector<2x4x1xf32>
    %cst_14 = arith.constant dense<0.000000e+00> : vector<4x1xf32>
    %14 = vector.multi_reduction <add>, %13, %cst_14 [0] : vector<2x4x1xf32> to vector<4x1xf32>
    %15 = arith.addf %11, %14 : vector<4x1xf32>
    %c0_15 = arith.constant 0 : index
    %c0_16 = arith.constant 0 : index
    %16 = vector.load %arg16[%c0_15, %c0_16] : memref<4x1xf32, #tpu.memory_space<vmem>>, vector<4x1xf32>
    tpu.vector_store %arg16[%c0_15, %c0_16], %15 {strides = array<i32>} : memref<4x1xf32, #tpu.memory_space<vmem>>, vector<4x1xf32>,
    %c0_17 = arith.constant 0 : index
    %c0_18 = arith.constant 0 : index
    %17 = vector.load %arg17[%c0_17, %c0_18] : memref<4x1xf32, #tpu.memory_space<vmem>>, vector<4x1xf32>
    %18 = arith.mulf %3, %3 : vector<2x4x256xf32>
    %cst_19 = arith.constant dense<0.000000e+00> : vector<2x4xf32>
    %19 = vector.multi_reduction <add>, %18, %cst_19 [2] : vector<2x4x256xf32> to vector<2x4xf32>
    %20 = vector.shape_cast %19 : vector<2x4xf32> to vector<2x4x1xf32>
    %cst_20 = arith.constant dense<0.000000e+00> : vector<4x1xf32>
    %21 = vector.multi_reduction <add>, %20, %cst_20 [0] : vector<2x4x1xf32> to vector<4x1xf32>
    %22 = arith.addf %17, %21 : vector<4x1xf32>
    %c0_21 = arith.constant 0 : index
    %c0_22 = arith.constant 0 : index
    %23 = vector.load %arg17[%c0_21, %c0_22] : memref<4x1xf32, #tpu.memory_space<vmem>>, vector<4x1xf32>
    tpu.vector_store %arg17[%c0_21, %c0_22], %22 {strides = array<i32>} : memref<4x1xf32, #tpu.memory_space<vmem>>, vector<4x1xf32>,
    %c0_23 = arith.constant 0 : index
    %c0_24 = arith.constant 0 : index
    %24 = vector.load %arg18[%c0_23, %c0_24] : memref<4x1xf32, #tpu.memory_space<vmem>>, vector<4x1xf32>
    %25 = arith.mulf %3, %4 : vector<2x4x256xf32>
    %cst_25 = arith.constant dense<0.000000e+00> : vector<2x4xf32>
    %26 = vector.multi_reduction <add>, %25, %cst_25 [2] : vector<2x4x256xf32> to vector<2x4xf32>
    %27 = vector.shape_cast %26 : vector<2x4xf32> to vector<2x4x1xf32>
    %cst_26 = arith.constant dense<0.000000e+00> : vector<4x1xf32>
    %28 = vector.multi_reduction <add>, %27, %cst_26 [0] : vector<2x4x1xf32> to vector<4x1xf32>
    %29 = arith.addf %24, %28 : vector<4x1xf32>
    %c0_27 = arith.constant 0 : index
    %c0_28 = arith.constant 0 : index
    %30 = vector.load %arg18[%c0_27, %c0_28] : memref<4x1xf32, #tpu.memory_space<vmem>>, vector<4x1xf32>
    tpu.vector_store %arg18[%c0_27, %c0_28], %29 {strides = array<i32>} : memref<4x1xf32, #tpu.memory_space<vmem>>, vector<4x1xf32>,
    %c0_29 = arith.constant 0 : index
    %c0_30 = arith.constant 0 : index
    %31 = vector.load %arg19[%c0_29, %c0_30] : memref<4x1xf32, #tpu.memory_space<vmem>>, vector<4x1xf32>
    %32 = arith.mulf %4, %4 : vector<2x4x256xf32>
    %cst_31 = arith.constant dense<0.000000e+00> : vector<2x4xf32>
    %33 = vector.multi_reduction <add>, %32, %cst_31 [2] : vector<2x4x256xf32> to vector<2x4xf32>
    %34 = vector.shape_cast %33 : vector<2x4xf32> to vector<2x4x1xf32>
    %cst_32 = arith.constant dense<0.000000e+00> : vector<4x1xf32>
    %35 = vector.multi_reduction <add>, %34, %cst_32 [0] : vector<2x4x1xf32> to vector<4x1xf32>
    %36 = arith.addf %31, %35 : vector<4x1xf32>
    %c0_33 = arith.constant 0 : index
    %c0_34 = arith.constant 0 : index
    %37 = vector.load %arg19[%c0_33, %c0_34] : memref<4x1xf32, #tpu.memory_space<vmem>>, vector<4x1xf32>
    tpu.vector_store %arg19[%c0_33, %c0_34], %36 {strides = array<i32>} : memref<4x1xf32, #tpu.memory_space<vmem>>, vector<4x1xf32>,
    %c0_i32_35 = arith.constant 0 : i32
    %38 = arith.cmpi eq, %arg1, %c0_i32_35 : i32
    %39 = arith.extui %38 : i1 to i32
    %c0_i32_36 = arith.constant 0 : i32
    %40 = arith.cmpi ne, %39, %c0_i32_36 : i32
    scf.if %40 {
      %c0_37 = arith.constant 0 : index
      %c0_38 = arith.constant 0 : index
      %41 = vector.load %arg15[%c0_37, %c0_38] : memref<4x1xf32, #tpu.memory_space<vmem>>, vector<4x1xf32>
      %cst_39 = arith.constant 0.001953125 : f32
      %42 = vector.broadcast %cst_39 : f32 to vector<4x1xf32>
      %43 = arith.mulf %41, %42 : vector<4x1xf32>
      %c0_40 = arith.constant 0 : index
      %c0_41 = arith.constant 0 : index
      %44 = vector.load %arg16[%c0_40, %c0_41] : memref<4x1xf32, #tpu.memory_space<vmem>>, vector<4x1xf32>
      %cst_42 = arith.constant 0.001953125 : f32
      %45 = vector.broadcast %cst_42 : f32 to vector<4x1xf32>
      %46 = arith.mulf %44, %45 : vector<4x1xf32>
      %c0_43 = arith.constant 0 : index
      %c0_44 = arith.constant 0 : index
      %47 = vector.load %arg17[%c0_43, %c0_44] : memref<4x1xf32, #tpu.memory_space<vmem>>, vector<4x1xf32>
      %cst_45 = arith.constant 0.001953125 : f32
      %48 = vector.broadcast %cst_45 : f32 to vector<4x1xf32>
      %49 = arith.mulf %47, %48 : vector<4x1xf32>
      %50 = arith.mulf %43, %43 : vector<4x1xf32>
      %51 = arith.subf %49, %50 : vector<4x1xf32>
      %cst_46 = arith.constant 9.99999974E-6 : f32
      %52 = vector.broadcast %cst_46 : f32 to vector<4x1xf32>
      %53 = arith.addf %51, %52 : vector<4x1xf32>
      %c0_47 = arith.constant 0 : index
      %c0_48 = arith.constant 0 : index
      %54 = vector.load %arg18[%c0_47, %c0_48] : memref<4x1xf32, #tpu.memory_space<vmem>>, vector<4x1xf32>
      %cst_49 = arith.constant 0.001953125 : f32
      %55 = vector.broadcast %cst_49 : f32 to vector<4x1xf32>
      %56 = arith.mulf %54, %55 : vector<4x1xf32>
      %57 = arith.mulf %43, %46 : vector<4x1xf32>
      %58 = arith.subf %56, %57 : vector<4x1xf32>
      %c0_50 = arith.constant 0 : index
      %c0_51 = arith.constant 0 : index
      %59 = vector.load %arg19[%c0_50, %c0_51] : memref<4x1xf32, #tpu.memory_space<vmem>>, vector<4x1xf32>
      %cst_52 = arith.constant 0.001953125 : f32
      %60 = vector.broadcast %cst_52 : f32 to vector<4x1xf32>
      %61 = arith.mulf %59, %60 : vector<4x1xf32>
      %62 = arith.mulf %46, %46 : vector<4x1xf32>
      %63 = arith.subf %61, %62 : vector<4x1xf32>
      %cst_53 = arith.constant 9.99999974E-6 : f32
      %64 = vector.broadcast %cst_53 : f32 to vector<4x1xf32>
      %65 = arith.addf %63, %64 : vector<4x1xf32>
      %66 = arith.addf %53, %65 : vector<4x1xf32>
      %67 = arith.mulf %53, %65 : vector<4x1xf32>
      %68 = arith.mulf %58, %58 : vector<4x1xf32>
      %69 = arith.subf %67, %68 : vector<4x1xf32>
      %70 = math.sqrt %69 : vector<4x1xf32>
      %cst_54 = arith.constant 2.000000e+00 : f32
      %71 = vector.broadcast %cst_54 : f32 to vector<4x1xf32>
      %72 = arith.mulf %71, %70 : vector<4x1xf32>
      %73 = arith.addf %66, %72 : vector<4x1xf32>
      %74 = math.sqrt %73 : vector<4x1xf32>
      %75 = arith.mulf %70, %74 : vector<4x1xf32>
      %cst_55 = arith.constant 1.000000e+00 : f32
      %76 = vector.broadcast %cst_55 : f32 to vector<4x1xf32>
      %77 = arith.divf %76, %75 : vector<4x1xf32>
      %78 = arith.addf %70, %65 : vector<4x1xf32>
      %79 = arith.mulf %78, %77 : vector<4x1xf32>
      %80 = arith.addf %70, %53 : vector<4x1xf32>
      %81 = arith.mulf %80, %77 : vector<4x1xf32>
      %cst_56 = arith.constant 0.000000e+00 : f32
      %82 = vector.broadcast %cst_56 : f32 to vector<4x1xf32>
      %83 = arith.subf %82, %58 : vector<4x1xf32>
      %84 = arith.mulf %83, %77 : vector<4x1xf32>
      %c0_57 = arith.constant 0 : index
      %c0_58 = arith.constant 0 : index
      %85 = vector.load %arg4[%c0_57, %c0_58] : memref<4x1xf32, #tpu.memory_space<vmem>>, vector<4x1xf32>
      %c0_59 = arith.constant 0 : index
      %c0_60 = arith.constant 0 : index
      %86 = vector.load %arg5[%c0_59, %c0_60] : memref<4x1xf32, #tpu.memory_space<vmem>>, vector<4x1xf32>
      %c0_61 = arith.constant 0 : index
      %c0_62 = arith.constant 0 : index
      %87 = vector.load %arg6[%c0_61, %c0_62] : memref<4x1xf32, #tpu.memory_space<vmem>>, vector<4x1xf32>
      %88 = arith.mulf %85, %79 : vector<4x1xf32>
      %89 = arith.mulf %86, %84 : vector<4x1xf32>
      %90 = arith.addf %88, %89 : vector<4x1xf32>
      %91 = arith.mulf %85, %84 : vector<4x1xf32>
      %92 = arith.mulf %86, %81 : vector<4x1xf32>
      %93 = arith.addf %91, %92 : vector<4x1xf32>
      %94 = arith.mulf %86, %79 : vector<4x1xf32>
      %95 = arith.mulf %87, %84 : vector<4x1xf32>
      %96 = arith.addf %94, %95 : vector<4x1xf32>
      %97 = arith.mulf %86, %84 : vector<4x1xf32>
      %98 = arith.mulf %87, %81 : vector<4x1xf32>
      %99 = arith.addf %97, %98 : vector<4x1xf32>
      %c0_63 = arith.constant 0 : index
      %c0_64 = arith.constant 0 : index
      %100 = vector.load %arg9[%c0_63, %c0_64] : memref<4x1xf32, #tpu.memory_space<vmem>>, vector<4x1xf32>
      tpu.vector_store %arg9[%c0_63, %c0_64], %90 {strides = array<i32>} : memref<4x1xf32, #tpu.memory_space<vmem>>, vector<4x1xf32>,
      %c0_65 = arith.constant 0 : index
      %c0_66 = arith.constant 0 : index
      %101 = vector.load %arg10[%c0_65, %c0_66] : memref<4x1xf32, #tpu.memory_space<vmem>>, vector<4x1xf32>
      tpu.vector_store %arg10[%c0_65, %c0_66], %93 {strides = array<i32>} : memref<4x1xf32, #tpu.memory_space<vmem>>, vector<4x1xf32>,
      %c0_67 = arith.constant 0 : index
      %c0_68 = arith.constant 0 : index
      %102 = vector.load %arg11[%c0_67, %c0_68] : memref<4x1xf32, #tpu.memory_space<vmem>>, vector<4x1xf32>
      tpu.vector_store %arg11[%c0_67, %c0_68], %96 {strides = array<i32>} : memref<4x1xf32, #tpu.memory_space<vmem>>, vector<4x1xf32>,
      %c0_69 = arith.constant 0 : index
      %c0_70 = arith.constant 0 : index
      %103 = vector.load %arg12[%c0_69, %c0_70] : memref<4x1xf32, #tpu.memory_space<vmem>>, vector<4x1xf32>
      tpu.vector_store %arg12[%c0_69, %c0_70], %99 {strides = array<i32>} : memref<4x1xf32, #tpu.memory_space<vmem>>, vector<4x1xf32>,
      %c0_71 = arith.constant 0 : index
      %c0_72 = arith.constant 0 : index
      %104 = vector.load %arg7[%c0_71, %c0_72] : memref<4x1xf32, #tpu.memory_space<vmem>>, vector<4x1xf32>
      %105 = arith.mulf %90, %43 : vector<4x1xf32>
      %106 = arith.subf %104, %105 : vector<4x1xf32>
      %107 = arith.mulf %93, %46 : vector<4x1xf32>
      %108 = arith.subf %106, %107 : vector<4x1xf32>
      %c0_73 = arith.constant 0 : index
      %c0_74 = arith.constant 0 : index
      %109 = vector.load %arg13[%c0_73, %c0_74] : memref<4x1xf32, #tpu.memory_space<vmem>>, vector<4x1xf32>
      tpu.vector_store %arg13[%c0_73, %c0_74], %108 {strides = array<i32>} : memref<4x1xf32, #tpu.memory_space<vmem>>, vector<4x1xf32>,
      %c0_75 = arith.constant 0 : index
      %c0_76 = arith.constant 0 : index
      %110 = vector.load %arg8[%c0_75, %c0_76] : memref<4x1xf32, #tpu.memory_space<vmem>>, vector<4x1xf32>
      %111 = arith.mulf %96, %43 : vector<4x1xf32>
      %112 = arith.subf %110, %111 : vector<4x1xf32>
      %113 = arith.mulf %99, %46 : vector<4x1xf32>
      %114 = arith.subf %112, %113 : vector<4x1xf32>
      %c0_77 = arith.constant 0 : index
      %c0_78 = arith.constant 0 : index
      %115 = vector.load %arg14[%c0_77, %c0_78] : memref<4x1xf32, #tpu.memory_space<vmem>>, vector<4x1xf32>
      tpu.vector_store %arg14[%c0_77, %c0_78], %114 {strides = array<i32>} : memref<4x1xf32, #tpu.memory_space<vmem>>, vector<4x1xf32>,
    } else {
    }
    return
  }
  func.func @transform_0(%arg0: i32, %arg1: i32) -> (i32, i32, i32) {
    %c0_i32 = arith.constant 0 : i32
    %c0_i32_0 = arith.constant 0 : i32
    return %c0_i32, %arg0, %arg1 : i32, i32, i32
  }
  func.func @transform_1(%arg0: i32, %arg1: i32) -> (i32, i32, i32) {
    %c0_i32 = arith.constant 0 : i32
    %c0_i32_0 = arith.constant 0 : i32
    return %c0_i32, %arg0, %arg1 : i32, i32, i32
  }
  func.func @transform_2(%arg0: i32, %arg1: i32) -> (i32, i32) {
    %c0_i32 = arith.constant 0 : i32
    %c0_i32_0 = arith.constant 0 : i32
    return %arg0, %c0_i32 : i32, i32
  }
  func.func @transform_3(%arg0: i32, %arg1: i32) -> (i32, i32) {
    %c0_i32 = arith.constant 0 : i32
    %c0_i32_0 = arith.constant 0 : i32
    return %arg0, %c0_i32 : i32, i32
  }
  func.func @transform_4(%arg0: i32, %arg1: i32) -> (i32, i32) {
    %c0_i32 = arith.constant 0 : i32
    %c0_i32_0 = arith.constant 0 : i32
    return %arg0, %c0_i32 : i32, i32
  }
  func.func @transform_5(%arg0: i32, %arg1: i32) -> (i32, i32) {
    %c0_i32 = arith.constant 0 : i32
    %c0_i32_0 = arith.constant 0 : i32
    return %arg0, %c0_i32 : i32, i32
  }
  func.func @transform_6(%arg0: i32, %arg1: i32) -> (i32, i32) {
    %c0_i32 = arith.constant 0 : i32
    %c0_i32_0 = arith.constant 0 : i32
    return %arg0, %c0_i32 : i32, i32
  }
  func.func @transform_7(%arg0: i32, %arg1: i32) -> (i32, i32) {
    %c0_i32 = arith.constant 0 : i32
    %c0_i32_0 = arith.constant 0 : i32
    return %arg0, %c0_i32 : i32, i32
  }
  func.func @transform_8(%arg0: i32, %arg1: i32) -> (i32, i32) {
    %c0_i32 = arith.constant 0 : i32
    %c0_i32_0 = arith.constant 0 : i32
    return %arg0, %c0_i32 : i32, i32
  }
  func.func @transform_9(%arg0: i32, %arg1: i32) -> (i32, i32) {
    %c0_i32 = arith.constant 0 : i32
    %c0_i32_0 = arith.constant 0 : i32
    return %arg0, %c0_i32 : i32, i32
  }
  func.func @transform_10(%arg0: i32, %arg1: i32) -> (i32, i32) {
    %c0_i32 = arith.constant 0 : i32
    %c0_i32_0 = arith.constant 0 : i32
    return %arg0, %c0_i32 : i32, i32
  }
  func.func @transform_11(%arg0: i32, %arg1: i32) -> (i32, i32) {
    %c0_i32 = arith.constant 0 : i32
    %c0_i32_0 = arith.constant 0 : i32
    return %arg0, %c0_i32 : i32, i32
  }
  func.func @transform_12(%arg0: i32, %arg1: i32) -> (i32, i32) {
    %c0_i32 = arith.constant 0 : i32
    %c0_i32_0 = arith.constant 0 : i32
    return %arg0, %c0_i32 : i32, i32
  }
}

</mosaic_0001>

<bundles_post_ra>
// kernel: tpu_custom_call.1
= control target key start
LH: loop header
LB: loop body
LE: loop exit
PB: predicated region body
PF: predicated region fallthrough
CT: control target
= control target key end

     0   :  { %18 = vsyncpa [#allocation8], 0  ;;  %s321_s21 = smov [#allocation7]   ;;  %s501_s0 = inlined_call_operand.vmem [shape: f32[2,4,256], index: 0, kind: input, shape index: {}]   ;;  %s502_s1 = inlined_call_operand.hbm [shape: f32[2,4,256], index: 1, kind: input, shape index: {}]   ;;  %s503_s2 = inlined_call_operand.vmem [shape: f32[4,1], index: 2, kind: input, shape index: {}]   ;;  %s504_s3 = inlined_call_operand.vmem [shape: f32[4,1], index: 3, kind: input, shape index: {}]   ;;  %s505_s4 = inlined_call_operand.vmem [shape: f32[4,1], index: 4, kind: input, shape index: {}]   ;;  %s506_s5 = inlined_call_operand.vmem [shape: f32[4,1], index: 5, kind: input, shape index: {}]   ;;  %s507_s6 = inlined_call_operand.vmem [shape: f32[4,1], index: 6, kind: input, shape index: {}]   ;;  %s508_s7 = inlined_call_operand.vmem [shape: f32[4,1], index: 7, kind: output, shape index: {0}]   ;;  %s509_s8 = inlined_call_operand.vmem [shape: f32[4,1], index: 8, kind: output, shape index: {1}]   ;;  %s510_s9 = inlined_call_operand.vmem [shape: f32[4,1], index: 9, kind: output, shape index: {2}]   ;;  %s511_s10 = inlined_call_operand.vmem [shape: f32[4,1], index: 10, kind: output, shape index: {3}]   ;;  %s512_s11 = inlined_call_operand.vmem [shape: f32[4,1], index: 11, kind: output, shape index: {4}]   ;;  %s513_s12 = inlined_call_operand.vmem [shape: f32[4,1], index: 12, kind: output, shape index: {5}]  }
   0x1   :  { %s26_s22 = sshll.u32 %s321_s21, 4  ;;  %s297_s25 = scalar_lea.hbm %s502_s1, 256  ;;  %s27_s22 = int_to_ptr.vmem [resolvable:$true] %s26_s22 }
   0x2   :  { %p298_p0 = scmp.ne.s32.totalorder %s502_s1, %s297_s25  ;;  %p301_p1 = scmp.lt.u32.totalorder %s297_s25, %s502_s1 }
   0x4   :  { %p303_p2 = pnand %p301_p1, %p298_p0 }
   0x6   :  { %306 = shalt.err (!%p303_p2)
}
   0x7   :  { %s307_s30 = scalar_lea.vmem %s27_s22, 256  ;;  %p312_p4 = scmp.lt.s32.totalorder %s27_s22, %s27_s22 }
   0x8   :  { %p308_p3 = scmp.ne.s32.totalorder %s27_s22, %s307_s30  ;;  %p313_p5 = scmp.lt.s32.totalorder %s307_s30, %s307_s30 }
   0xa   :  { %p314_p6 = por %p313_p5, %p312_p4 }
   0xc   :  { %p315_p7 = pnand %p314_p6, %p308_p3 }
   0xe   :  { %318 = shalt.err (!%p315_p7)
}
   0xf   :  { %s322_s13 = smov 128   ;;  %s323_s14 = smov 8  }
  0x10   :  { %32 = dma.hbm_to_vmem [thread:$0]  %s502_s1, 256, %s27_s22, [#allocation8], %s322_s13, %s322_s13, %s323_s14  }
  0x11   :  { %319 = dma.done.wait [#allocation8], 256  }
  0x12   :  { %320 = vsyncadd [#allocation8], 4294967040  ;;  %vm67_vm0 = vcmask 1043456   ;;  %v58_v0 = vld [vmem:[#allocation7] sm:$0xff]  ;;  %v56_v1 = vld [vmem:[%s501_s0] sm:$0xff]  ;;  %vm50_vm1 = vcmask 3072  }
  0x13   :  { %v59_v2 = vld [vmem:[#allocation7 + $0x8] sm:$0xff]  ;;  %v87_v3 = vcombine.high %v58_v0, %v58_v0  ;;  %v91_v4 = vsel %vm67_vm0, %v58_v0, 0.0  ;;  %v63_v5 = vcombine.high %v56_v1, %v56_v1  ;;  %v68_v6 = vsel %vm67_vm0, %v56_v1, 0.0  ;;  %v57_v7 = vld [vmem:[%s501_s0 + $0x8] sm:$0xff] }
  0x14   :  { %v88_v8 = vcombine.high %v59_v2, %v59_v2  ;;  %v96_v9 = vsel %vm67_vm0, %v59_v2, 0.0  ;;  %v64_v10 = vcombine.high %v57_v7, %v57_v7  ;;  %v73_v11 = vsel %vm67_vm0, %v57_v7, 0.0 }
  0x15   :  { %v92_v12 = vsel %vm67_vm0, %v87_v3, 0.0  ;;  %v69_v13 = vsel %vm67_vm0, %v63_v5, 0.0  ;;  %v108_v14 = vmul.f32 %v57_v7, %v57_v7  ;;  %v107_v15 = vmul.f32 %v56_v1, %v56_v1 }
  0x16   :  { %v93_v16 = vadd.f32 %v92_v12, %v91_v4  ;;  %v70_v17 = vadd.f32 %v69_v13, %v68_v6  ;;  %v97_v18 = vsel %vm67_vm0, %v88_v8, 0.0  ;;  %v74_v19 = vsel %vm67_vm0, %v64_v10, 0.0 }
  0x17   :  { %v98_v20 = vadd.f32 %v97_v18, %v96_v9  ;;  %v75_v21 = vadd.f32 %v74_v19, %v73_v11  ;;  %v112_v22 = vcombine.high %v108_v14, %v108_v14  ;;  %v120_v23 = vsel %vm67_vm0, %v108_v14, 0.0 }
  0x18   :  { %94 = vadd.xlane.f32.xlu1 %v93_v16  ;;  %71 = vadd.xlane.f32.xlu0 %v70_v17  ;;  %v111_v24 = vcombine.high %v107_v15, %v107_v15  ;;  %v156_v25 = vmul.f32 %v59_v2, %v59_v2  ;;  %v155_v26 = vmul.f32 %v58_v0, %v58_v0  ;;  %v115_v28 = vsel %vm67_vm0, %v107_v15, 0.0 }
  0x19   :  { %v121_v27 = vsel %vm67_vm0, %v112_v22, 0.0  ;;  %v132_v29 = vmul.f32 %v59_v2, %v57_v7  ;;  %v131_v30 = vmul.f32 %v58_v0, %v56_v1  ;;  %v324_v50 = vmov 0.0  }
  0x1a   :  { %v116_v31 = vsel %vm67_vm0, %v111_v24, 0.0  ;;  %v160_v32 = vcombine.high %v156_v25, %v156_v25  ;;  %v159_v33 = vcombine.high %v155_v26, %v155_v26  ;;  %v122_v34 = vadd.f32 %v121_v27, %v120_v23  ;;  %52 = vst.msk [vmem:[#allocation3] sm:$0xf] %vm50_vm1, %v324_v50  ;;  %51 = vst.msk [vmem:[#allocation2] sm:$0xf] %vm50_vm1, %v324_v50 }
  0x1b   :  { %v117_v35 = vadd.f32 %v116_v31, %v115_v28  ;;  %v168_v36 = vsel %vm67_vm0, %v156_v25, 0.0  ;;  %v163_v37 = vsel %vm67_vm0, %v155_v26, 0.0  ;;  %v136_v40 = vcombine.high %v132_v29, %v132_v29  ;;  %53 = vst.msk [vmem:[#allocation4] sm:$0xf] %vm50_vm1, %v324_v50  ;;  %54 = vst.msk [vmem:[#allocation5] sm:$0xf] %vm50_vm1, %v324_v50 }
  0x1c   :  { %99 = vadd.xlane.f32.xlu1 %v98_v20  ;;  %76 = vadd.xlane.f32.xlu0 %v75_v21  ;;  %v169_v38 = vsel %vm67_vm0, %v160_v32, 0.0  ;;  %v164_v39 = vsel %vm67_vm0, %v159_v33, 0.0  ;;  %v135_v41 = vcombine.high %v131_v30, %v131_v30  ;;  %v144_v44 = vsel %vm67_vm0, %v132_v29, 0.0  ;;  %55 = vst.msk [vmem:[#allocation6] sm:$0xf] %vm50_vm1, %v324_v50 }
  0x1d   :  { %v170_v42 = vadd.f32 %v169_v38, %v168_v36  ;;  %v165_v43 = vadd.f32 %v164_v39, %v163_v37  ;;  %v145_v45 = vsel %vm67_vm0, %v136_v40, 0.0  ;;  %v139_v46 = vsel %vm67_vm0, %v131_v30, 0.0 }
  0x1e   :  { %v140_v47 = vsel %vm67_vm0, %v135_v41, 0.0  ;;  %v146_v48 = vadd.f32 %v145_v45, %v144_v44 }
  0x1f   :  { %v141_v49 = vadd.f32 %v140_v47, %v139_v46 }
  0x20   :  { %123 = vadd.xlane.f32.xlu1 %v122_v34  ;;  %118 = vadd.xlane.f32.xlu0 %v117_v35 }
  0x21   :  { %v84_v54 = vld [vmem:[#allocation3] sm:$0xf]  ;;  %v60_v59 = vld [vmem:[#allocation2] sm:$0xf] }
  0x22   :  { %v106_v4 = vld [vmem:[#allocation4] sm:$0xf]  ;;  %v130_v18 = vld [vmem:[#allocation5] sm:$0xf] }
  0x23   :  { %v154_v11 = vld [vmem:[#allocation6] sm:$0xf] }
  0x24   :  { %171 = vadd.xlane.f32.xlu1 %v170_v42  ;;  %166 = vadd.xlane.f32.xlu0 %v165_v43 }
  0x28   :  { %147 = vadd.xlane.f32.xlu1 %v146_v48  ;;  %142 = vadd.xlane.f32.xlu0 %v141_v49 }
  0xa5   :  { %v95_v51 = vpop.xlane.xlu1 %94  ;;  %v72_v52 = vpop.xlane.xlu0 %71 }
  0xa6   :  { %v101_v56 = vsel %vm67_vm0, %v95_v51, 0.0  ;;  %v78_v57 = vsel %vm67_vm0, %v72_v52, 0.0 }
  0xa9   :  { %v100_v53 = vpop.xlane.xlu1 %99  ;;  %v77_v55 = vpop.xlane.xlu0 %76 }
  0xaa   :  { %v102_v58 = vsel %vm67_vm0, %v100_v53, 0.0  ;;  %v79_v60 = vsel %vm67_vm0, %v77_v55, 0.0 }
  0xab   :  { %v103_v61 = vadd.f32 %v102_v58, %v101_v56  ;;  %v80_v62 = vadd.f32 %v79_v60, %v78_v57 }
  0xad   :  { %v104_v63 = vadd.f32 %v103_v61, %v84_v54  ;;  %v81_v0 = vadd.f32 %v80_v62, %v60_v59  ;;  %v124_v1 = vpop.xlane.xlu1 %123  ;;  %v119_v2 = vpop.xlane.xlu0 %118  ;;  %v228_v61 = vld [vmem:[%s503_s2] sm:$0xf] }
  0xae   :  { %v126_v3 = vsel %vm67_vm0, %v124_v1, 0.0  ;;  %v125_v5 = vsel %vm67_vm0, %v119_v2, 0.0  ;;  %v229_v62 = vld [vmem:[%s504_s3] sm:$0xf] }
  0xaf   :  { %105 = vst.msk [vmem:[#allocation3] sm:$0xf] %vm50_vm1, %v104_v63  ;;  %83 = vst.msk [vmem:[#allocation2] sm:$0xf] %vm50_vm1, %v81_v0  ;;  %v127_v6 = vadd.f32 %v126_v3, %v125_v5  ;;  %v230_v63 = vld [vmem:[%s505_s4] sm:$0xf] }
  0xb1   :  { %v128_v7 = vadd.f32 %v127_v6, %v106_v4  ;;  %v172_v8 = vpop.xlane.xlu1 %171  ;;  %v167_v9 = vpop.xlane.xlu0 %166 }
  0xb2   :  { %v174_v10 = vsel %vm67_vm0, %v172_v8, 0.0  ;;  %v173_v12 = vsel %vm67_vm0, %v167_v9, 0.0 }
  0xb3   :  { %129 = vst.msk [vmem:[#allocation4] sm:$0xf] %vm50_vm1, %v128_v7  ;;  %v175_v13 = vadd.f32 %v174_v10, %v173_v12  ;;  %v246_v12 = vld [vmem:[%s506_s5] sm:$0xf] }
  0xb5   :  { %v176_v14 = vadd.f32 %v175_v13, %v154_v11  ;;  %v148_v15 = vpop.xlane.xlu1 %147  ;;  %v143_v16 = vpop.xlane.xlu0 %142 }
  0xb6   :  { %v150_v17 = vsel %vm67_vm0, %v148_v15, 0.0  ;;  %v149_v19 = vsel %vm67_vm0, %v143_v16, 0.0  ;;  %v183_v21 = vld [vmem:[#allocation3] sm:$0xf]  ;;  %v181_v22 = vld [vmem:[#allocation2] sm:$0xf] }
  0xb7   :  { %177 = vst.msk [vmem:[#allocation6] sm:$0xf] %vm50_vm1, %v176_v14  ;;  %v151_v20 = vadd.f32 %v150_v17, %v149_v19  ;;  %v447_v25 = vmul.f32 0.001953125, %v183_v21  ;;  %v449_v26 = vmul.f32 0.001953125, %v181_v22  ;;  %v252_v15 = vld [vmem:[%s507_s6] sm:$0xf] }
  0xb9   :  { %v152_v23 = vadd.f32 %v151_v20, %v130_v18  ;;  %v187_v29 = vmul.f32 %v449_v26, %v449_v26  ;;  %v196_v31 = vmul.f32 %v447_v25, %v447_v25  ;;  %v192_v37 = vmul.f32 %v447_v25, %v449_v26 }
  0xba   :  { %v185_v24 = vld [vmem:[#allocation4] sm:$0xf] }
  0xbb   :  { %153 = vst.msk [vmem:[#allocation5] sm:$0xf] %vm50_vm1, %v152_v23  ;;  %v186_v27 = vmul.f32 0.001953125, %v185_v24 }
  0xbd   :  { %v188_v32 = vsub.f32 %v186_v27, %v187_v29 }
  0xbe   :  { %v194_v28 = vld [vmem:[#allocation6] sm:$0xf] }
  0xbf   :  { %v195_v30 = vmul.f32 0.001953125, %v194_v28  ;;  %v189_v38 = vadd.f32 1e-05, %v188_v32 }
  0xc1   :  { %v197_v33 = vsub.f32 %v195_v30, %v196_v31 }
  0xc2   :  { %v190_v34 = vld [vmem:[#allocation5] sm:$0xf] }
  0xc3   :  { %v198_v35 = vadd.f32 1e-05, %v197_v33  ;;  %v191_v36 = vmul.f32 0.001953125, %v190_v34 }
  0xc5   :  { %v193_v39 = vsub.f32 %v191_v36, %v192_v37  ;;  %v200_v40 = vmul.f32 %v198_v35, %v189_v38  ;;  %v199_v48 = vadd.f32 %v198_v35, %v189_v38 }
  0xc7   :  { %v201_v41 = vmul.f32 %v193_v39, %v193_v39  ;;  %v226_v59 = vsub.f32 0.0, %v193_v39 }
  0xc9   :  { %v202_v42 = vsub.f32 %v200_v40, %v201_v41 }
  0xcb   :  { %291 = vrsqrt.f32 %v202_v42  ;;  %vm205_vm2 = vcmp.eq.f32.partialorder %v202_v42, inf  ;;  %v208_v45 = vand.u32 2147483648, %v202_v42  ;;  %vm207_vm3 = vcmp.eq.f32.partialorder %v202_v42, 0.0 }
  0xd5   :  { %v292_v43 = vpop.eup %291 }
  0xd6   :  { %v204_v44 = vmul.f32 %v292_v43, %v202_v42 }
  0xd8   :  { %v206_v46 = vsel %vm205_vm2, %v202_v42, %v204_v44 }
  0xd9   :  { %v209_v47 = vsel %vm207_vm3, %v208_v45, %v206_v46 }
  0xda   :  { %v210_v49 = vmul.f32 2.0, %v209_v47  ;;  %v222_v57 = vadd.f32 %v209_v47, %v198_v35  ;;  %v224_v58 = vadd.f32 %v209_v47, %v189_v38 }
  0xdc   :  { %v211_v50 = vadd.f32 %v210_v49, %v199_v48 }
  0xde   :  { %293 = vrsqrt.f32 %v211_v50  ;;  %vm214_vm4 = vcmp.eq.f32.partialorder %v211_v50, inf  ;;  %v217_v53 = vand.u32 2147483648, %v211_v50  ;;  %vm216_vm5 = vcmp.eq.f32.partialorder %v211_v50, 0.0 }
  0xe8   :  { %v294_v51 = vpop.eup %293 }
  0xe9   :  { %v213_v52 = vmul.f32 %v294_v51, %v211_v50 }
  0xeb   :  { %v215_v54 = vsel %vm214_vm4, %v211_v50, %v213_v52 }
  0xec   :  { %v218_v55 = vsel %vm216_vm5, %v217_v53, %v215_v54 }
  0xed   :  { %v219_v56 = vmul.f32 %v218_v55, %v209_v47 }
  0xef   :  { %295 = vrcp.f32 %v219_v56 }
  0xf9   :  { %v296_v60 = vpop.eup %295 }
  0xfa   :  { %v223_v0 = vmul.f32 %v296_v60, %v222_v57  ;;  %v225_v1 = vmul.f32 %v296_v60, %v224_v58  ;;  %v227_v2 = vmul.f32 %v296_v60, %v226_v59 }
  0xfc   :  { %v231_v3 = vmul.f32 %v228_v61, %v223_v0  ;;  %v232_v4 = vmul.f32 %v229_v62, %v227_v2  ;;  %v234_v5 = vmul.f32 %v228_v61, %v227_v2  ;;  %v235_v6 = vmul.f32 %v229_v62, %v225_v1 }
  0xfd   :  { %v237_v7 = vmul.f32 %v229_v62, %v223_v0  ;;  %v238_v8 = vmul.f32 %v230_v63, %v227_v2  ;;  %v240_v9 = vmul.f32 %v230_v63, %v225_v1 }
  0xfe   :  { %v233_v10 = vadd.f32 %v232_v4, %v231_v3  ;;  %v236_v11 = vadd.f32 %v235_v6, %v234_v5 }
  0xff   :  { %v239_v13 = vadd.f32 %v238_v8, %v237_v7  ;;  %v241_v14 = vadd.f32 %v240_v9, %v232_v4 }
 0x100   :  { %242 = vst.msk [vmem:[%s508_s7] sm:$0xf] %vm50_vm1, %v233_v10  ;;  %243 = vst.msk [vmem:[%s509_s8] sm:$0xf] %vm50_vm1, %v236_v11  ;;  %v247_v16 = vmul.f32 %v233_v10, %v449_v26  ;;  %v249_v19 = vmul.f32 %v236_v11, %v447_v25 }
 0x101   :  { %244 = vst.msk [vmem:[%s510_s9] sm:$0xf] %vm50_vm1, %v239_v13  ;;  %245 = vst.msk [vmem:[%s511_s10] sm:$0xf] %vm50_vm1, %v241_v14  ;;  %v253_v17 = vmul.f32 %v239_v13, %v449_v26  ;;  %v255_v21 = vmul.f32 %v241_v14, %v447_v25 }
 0x102   :  { %v248_v18 = vsub.f32 %v246_v12, %v247_v16 }
 0x103   :  { %v254_v20 = vsub.f32 %v252_v15, %v253_v17 }
 0x104   :  { %v250_v22 = vsub.f32 %v248_v18, %v249_v19 }
 0x105   :  { %v256_v23 = vsub.f32 %v254_v20, %v255_v21 }
 0x106   :  { %251 = vst.msk [vmem:[%s512_s11] sm:$0xf] %vm50_vm1, %v250_v22 }
 0x107   :  { %257 = vst.msk [vmem:[%s513_s12] sm:$0xf] %vm50_vm1, %v256_v23 }
 0x108   :  { %282 = vsyncpa [#allocation8], 1 }

</bundles_post_ra>
